<compile_context>
chip_gen: v5e
topology: v5e:2x2
jax: 0.10.0
libtpu: 0.0.40
codegen_flags: <defaults>
</compile_context>

<pallas_src>
import functools

import jax
import jax.numpy as jnp
from jax.experimental import pallas as pl
from jax.experimental.pallas import tpu as pltpu

_LANE = 128


def _round_up(x, m):
    return ((x + m - 1) // m) * m


def _mlp_kernel(x_ref, w1_ref, b1_ref, w2_ref, b2_ref, w3_ref, b3_ref, o_ref):
    # One batch tile per grid step; all three matmuls + activations fused.
    x = x_ref[...]                                                   # bf16 [tb, in_dim]
    h1 = jnp.dot(x, w1_ref[...], preferred_element_type=jnp.float32) + b1_ref[...]
    h1 = jnp.maximum(h1, 0.0)                                        # ReLU (f32, VPU)
    h2 = jnp.dot(h1.astype(w2_ref.dtype), w2_ref[...],
                 preferred_element_type=jnp.float32) + b2_ref[...]
    h2 = jnp.maximum(h2, 0.0)                                        # ReLU (f32, VPU)
    z = jnp.dot(h2.astype(w3_ref.dtype), w3_ref[...],
                preferred_element_type=jnp.float32) + b3_ref[...]
    # sigmoid(2z')*2-1 == tanh(z'); the 0.5 is already folded into w3/b3.
    o_ref[...] = jnp.tanh(z).astype(o_ref.dtype)                     # EUP tanh


@functools.partial(jax.jit, static_argnames=("tile_b",))
def mlp_forward(x, w1, b1, w2, b2, w3, b3, *, tile_b=256):
    B, in_dim = x.shape
    hid = w1.shape[1]
    out_dim = w3.shape[1]

    # --- lane-dense padding of feature dims (exact: zero rows/cols contribute 0) ---
    hid_p = _round_up(hid, _LANE)
    out_p = _round_up(out_dim, _LANE)

    def pad2(a, rows, cols):
        return jnp.pad(a, ((0, rows - a.shape[0]), (0, cols - a.shape[1])))

    w1p = pad2(w1, in_dim, hid_p).astype(jnp.bfloat16)
    b1p = pad2(b1, 1, hid_p).astype(jnp.float32)
    w2p = pad2(w2, hid_p, hid_p).astype(jnp.bfloat16)
    b2p = pad2(b2, 1, hid_p).astype(jnp.float32)
    # Fold the 0.5 (sigmoid(z)*2-1 == tanh(0.5*z)) into the last layer.
    w3p = pad2(w3 * 0.5, hid_p, out_p).astype(jnp.bfloat16)
    b3p = pad2(b3 * 0.5, 1, out_p).astype(jnp.float32)

    # --- batch tiling: big tiles, pad B so the grid divides evenly ---
    tile_b = min(tile_b, _round_up(B, 8))
    B_p = pl.cdiv(B, tile_b) * tile_b
    xp = jnp.pad(x, ((0, B_p - B), (0, 0))).astype(jnp.bfloat16)

    grid = (B_p // tile_b,)
    # Weights/biases reused every grid step -> constant block index (VMEM resident).
    w_spec = lambda shape: pl.BlockSpec(shape, lambda i: (0, 0))

    flops = 2 * B_p * (in_dim * hid_p + hid_p * hid_p + hid_p * out_p)
    bytes_accessed = (xp.size * 2 + B_p * out_p * 4
                      + (w1p.size + w2p.size + w3p.size) * 2
                      + (b1p.size + b2p.size + b3p.size) * 4)

    out = pl.pallas_call(
        _mlp_kernel,
        out_shape=jax.ShapeDtypeStruct((B_p, out_p), jnp.float32),
        grid_spec=pltpu.PrefetchScalarGridSpec(
            num_scalar_prefetch=0,
            grid=grid,
            in_specs=[
                pl.BlockSpec((tile_b, in_dim), lambda i: (i, 0)),    # x tile (streamed)
                w_spec((in_dim, hid_p)),                             # w1
                w_spec((1, hid_p)),                                  # b1
                w_spec((hid_p, hid_p)),                              # w2
                w_spec((1, hid_p)),                                  # b2
                w_spec((hid_p, out_p)),                              # w3 (pre-scaled by 0.5)
                w_spec((1, out_p)),                                  # b3 (pre-scaled by 0.5)
            ],
            out_specs=pl.BlockSpec((tile_b, out_p), lambda i: (i, 0)),
        ),
        compiler_params=pltpu.CompilerParams(
            dimension_semantics=("parallel",),
        ),
        cost_estimate=pl.CostEstimate(
            flops=flops, transcendentals=B_p * out_p, bytes_accessed=bytes_accessed),
    )(xp, w1p, b1p, w2p, b2p, w3p, b3p)

    return out[:B, :out_dim]


def _init_linear(key, fan_in, fan_out):
    # Deterministic init mimicking nn.Linear default: U(-1/sqrt(fan_in), +1/sqrt(fan_in)).
    kw, kb = jax.random.split(key)
    bound = 1.0 / jnp.sqrt(fan_in)
    w = jax.random.uniform(kw, (fan_in, fan_out), jnp.float32, -bound, bound)
    b = jax.random.uniform(kb, (1, fan_out), jnp.float32, -bound, bound)
    return w, b


def _reference(x, w1, b1, w2, b2, w3, b3):
    # Mirrors the kernel's numeric path (bf16 MXU operands, f32 accumulation).
    bf = jnp.bfloat16
    h1 = jnp.maximum(
        jnp.dot(x.astype(bf), w1.astype(bf), preferred_element_type=jnp.float32) + b1, 0.0)
    h2 = jnp.maximum(
        jnp.dot(h1.astype(bf), w2.astype(bf), preferred_element_type=jnp.float32) + b2, 0.0)
    z = jnp.dot(h2.astype(bf), w3.astype(bf), preferred_element_type=jnp.float32) + b3
    return jax.nn.sigmoid(z) * 2.0 - 1.0


if __name__ == "__main__":
    in_dim, out_dim = 32, 16
    hid = in_dim * 2
    batch = 512          # with tile_b=256 the grid has 2 steps (both v7x TCs busy)

    key = jax.random.PRNGKey(0)
    kx, k1, k2, k3 = jax.random.split(key, 4)
    x = jax.random.normal(kx, (batch, in_dim), jnp.float32)
    w1, b1 = _init_linear(k1, in_dim, hid)
    w2, b2 = _init_linear(k2, hid, hid)
    w3, b3 = _init_linear(k3, hid, out_dim)

    out = mlp_forward(x, w1, b1, w2, b2, w3, b3, tile_b=256)
    out = jax.block_until_ready(out)

    ref = _reference(x, w1, b1, w2, b2, w3, b3)
    assert out.shape == (batch, out_dim)
    assert jnp.allclose(out, ref, atol=5e-3, rtol=5e-3)
    print("KERNEL_OK")
</pallas_src>

<mosaic_0001>
module attributes {stable_mosaic.version = 11 : i64} {
  func.func @_mlp_kernel(%arg0: i32, %arg1: memref<256x32xbf16, #tpu.memory_space<vmem>>, %arg2: memref<32x128xbf16, #tpu.memory_space<vmem>>, %arg3: memref<1x128xf32, #tpu.memory_space<vmem>>, %arg4: memref<128x128xbf16, #tpu.memory_space<vmem>>, %arg5: memref<1x128xf32, #tpu.memory_space<vmem>>, %arg6: memref<128x128xbf16, #tpu.memory_space<vmem>>, %arg7: memref<1x128xf32, #tpu.memory_space<vmem>>, %arg8: memref<256x128xf32, #tpu.memory_space<vmem>>) attributes {dimension_semantics = [#tpu.dimension_semantics<parallel>], iteration_bounds = array<i64: 2>, scalar_prefetch = 0 : i64, scratch_operands = 0 : i64, tpu.core_type = #tpu.core_type<tc>, window_params = [{transform_indices = @transform_0, window_bounds = array<i64: 256, 32>}, {pipeline_mode = #tpu.pipeline_mode<synchronous>, transform_indices = @transform_1, window_bounds = array<i64: 32, 128>}, {pipeline_mode = #tpu.pipeline_mode<synchronous>, transform_indices = @transform_2, window_bounds = array<i64: 1, 128>}, {pipeline_mode = #tpu.pipeline_mode<synchronous>, transform_indices = @transform_3, window_bounds = array<i64: 128, 128>}, {pipeline_mode = #tpu.pipeline_mode<synchronous>, transform_indices = @transform_4, window_bounds = array<i64: 1, 128>}, {pipeline_mode = #tpu.pipeline_mode<synchronous>, transform_indices = @transform_5, window_bounds = array<i64: 128, 128>}, {pipeline_mode = #tpu.pipeline_mode<synchronous>, transform_indices = @transform_6, window_bounds = array<i64: 1, 128>}, {transform_indices = @transform_7, window_bounds = array<i64: 256, 128>}]} {
    %c0 = arith.constant 0 : index
    %c0_0 = arith.constant 0 : index
    %0 = vector.load %arg1[%c0, %c0_0] : memref<256x32xbf16, #tpu.memory_space<vmem>>, vector<256x32xbf16>
    %c0_1 = arith.constant 0 : index
    %c0_2 = arith.constant 0 : index
    %1 = vector.load %arg2[%c0_1, %c0_2] : memref<32x128xbf16, #tpu.memory_space<vmem>>, vector<32x128xbf16>
    %cst = arith.constant dense<0.000000e+00> : vector<256x128xf32>
    %2 = tpu.matmul %0, %1, %cst {dimension_numbers = #tpu.dot_dimension_numbers<[1], [0], [0], [1], [0, 0, 1, 1], [], []>} : vector<256x32xbf16>, vector<32x128xbf16>, vector<256x128xf32> -> vector<256x128xf32>
    %c0_3 = arith.constant 0 : index
    %c0_4 = arith.constant 0 : index
    %3 = vector.load %arg3[%c0_3, %c0_4] : memref<1x128xf32, #tpu.memory_space<vmem>>, vector<1x128xf32>
    %4 = vector.broadcast %3 : vector<1x128xf32> to vector<256x128xf32>
    %5 = arith.addf %2, %4 : vector<256x128xf32>
    %cst_5 = arith.constant 0.000000e+00 : f32
    %6 = vector.broadcast %cst_5 : f32 to vector<256x128xf32>
    %7 = arith.maximumf %5, %6 : vector<256x128xf32>
    %8 = arith.truncf %7 : vector<256x128xf32> to vector<256x128xbf16>
    %c0_6 = arith.constant 0 : index
    %c0_7 = arith.constant 0 : index
    %9 = vector.load %arg4[%c0_6, %c0_7] : memref<128x128xbf16, #tpu.memory_space<vmem>>, vector<128x128xbf16>
    %cst_8 = arith.constant dense<0.000000e+00> : vector<256x128xf32>
    %10 = tpu.matmul %8, %9, %cst_8 {dimension_numbers = #tpu.dot_dimension_numbers<[1], [0], [0], [1], [0, 0, 1, 1], [], []>} : vector<256x128xbf16>, vector<128x128xbf16>, vector<256x128xf32> -> vector<256x128xf32>
    %c0_9 = arith.constant 0 : index
    %c0_10 = arith.constant 0 : index
    %11 = vector.load %arg5[%c0_9, %c0_10] : memref<1x128xf32, #tpu.memory_space<vmem>>, vector<1x128xf32>
    %12 = vector.broadcast %11 : vector<1x128xf32> to vector<256x128xf32>
    %13 = arith.addf %10, %12 : vector<256x128xf32>
    %cst_11 = arith.constant 0.000000e+00 : f32
    %14 = vector.broadcast %cst_11 : f32 to vector<256x128xf32>
    %15 = arith.maximumf %13, %14 : vector<256x128xf32>
    %16 = arith.truncf %15 : vector<256x128xf32> to vector<256x128xbf16>
    %c0_12 = arith.constant 0 : index
    %c0_13 = arith.constant 0 : index
    %17 = vector.load %arg6[%c0_12, %c0_13] : memref<128x128xbf16, #tpu.memory_space<vmem>>, vector<128x128xbf16>
    %cst_14 = arith.constant dense<0.000000e+00> : vector<256x128xf32>
    %18 = tpu.matmul %16, %17, %cst_14 {dimension_numbers = #tpu.dot_dimension_numbers<[1], [0], [0], [1], [0, 0, 1, 1], [], []>} : vector<256x128xbf16>, vector<128x128xbf16>, vector<256x128xf32> -> vector<256x128xf32>
    %c0_15 = arith.constant 0 : index
    %c0_16 = arith.constant 0 : index
    %19 = vector.load %arg7[%c0_15, %c0_16] : memref<1x128xf32, #tpu.memory_space<vmem>>, vector<1x128xf32>
    %20 = vector.broadcast %19 : vector<1x128xf32> to vector<256x128xf32>
    %21 = arith.addf %18, %20 : vector<256x128xf32>
    %22 = math.tanh %21 : vector<256x128xf32>
    %c0_17 = arith.constant 0 : index
    %c0_18 = arith.constant 0 : index
    %23 = vector.load %arg8[%c0_17, %c0_18] : memref<256x128xf32, #tpu.memory_space<vmem>>, vector<256x128xf32>
    tpu.vector_store %arg8[%c0_17, %c0_18], %22 {strides = array<i32>} : memref<256x128xf32, #tpu.memory_space<vmem>>, vector<256x128xf32>,
    return
  }
  func.func @transform_0(%arg0: i32) -> (i32, i32) {
    %c0_i32 = arith.constant 0 : i32
    %c0_i32_0 = arith.constant 0 : i32
    return %arg0, %c0_i32 : i32, i32
  }
  func.func @transform_1(%arg0: i32) -> (i32, i32) {
    %c0_i32 = arith.constant 0 : i32
    %c0_i32_0 = arith.constant 0 : i32
    %c0_i32_1 = arith.constant 0 : i32
    return %c0_i32, %c0_i32_0 : i32, i32
  }
  func.func @transform_2(%arg0: i32) -> (i32, i32) {
    %c0_i32 = arith.constant 0 : i32
    %c0_i32_0 = arith.constant 0 : i32
    %c0_i32_1 = arith.constant 0 : i32
    return %c0_i32, %c0_i32_0 : i32, i32
  }
  func.func @transform_3(%arg0: i32) -> (i32, i32) {
    %c0_i32 = arith.constant 0 : i32
    %c0_i32_0 = arith.constant 0 : i32
    %c0_i32_1 = arith.constant 0 : i32
    return %c0_i32, %c0_i32_0 : i32, i32
  }
  func.func @transform_4(%arg0: i32) -> (i32, i32) {
    %c0_i32 = arith.constant 0 : i32
    %c0_i32_0 = arith.constant 0 : i32
    %c0_i32_1 = arith.constant 0 : i32
    return %c0_i32, %c0_i32_0 : i32, i32
  }
  func.func @transform_5(%arg0: i32) -> (i32, i32) {
    %c0_i32 = arith.constant 0 : i32
    %c0_i32_0 = arith.constant 0 : i32
    %c0_i32_1 = arith.constant 0 : i32
    return %c0_i32, %c0_i32_0 : i32, i32
  }
  func.func @transform_6(%arg0: i32) -> (i32, i32) {
    %c0_i32 = arith.constant 0 : i32
    %c0_i32_0 = arith.constant 0 : i32
    %c0_i32_1 = arith.constant 0 : i32
    return %c0_i32, %c0_i32_0 : i32, i32
  }
  func.func @transform_7(%arg0: i32) -> (i32, i32) {
    %c0_i32 = arith.constant 0 : i32
    %c0_i32_0 = arith.constant 0 : i32
    return %arg0, %c0_i32 : i32, i32
  }
}

</mosaic_0001>

<bundles_post_ra>
// kernel: mlp_forward.1
= control target key start
LH: loop header
LB: loop body
LE: loop exit
PB: predicated region body
PF: predicated region fallthrough
CT: control target
= control target key end

     0   :  { %s1421_s24 = smov 0   ;;  %s1675_s0 = inlined_call_operand.vmem [shape: bf16[512,32], index: 0, kind: input, shape index: {}]   ;;  %s1676_s1 = inlined_call_operand.vmem [shape: bf16[32,128], index: 1, kind: input, shape index: {}]   ;;  %s1677_s2 = inlined_call_operand.vmem [shape: f32[1,128], index: 2, kind: input, shape index: {}]   ;;  %s1678_s3 = inlined_call_operand.vmem [shape: bf16[128,128], index: 3, kind: input, shape index: {}]   ;;  %s1679_s4 = inlined_call_operand.vmem [shape: f32[1,128], index: 4, kind: input, shape index: {}]   ;;  %s1680_s5 = inlined_call_operand.vmem [shape: bf16[128,128], index: 5, kind: input, shape index: {}]   ;;  %s1681_s6 = inlined_call_operand.vmem [shape: f32[1,128], index: 6, kind: input, shape index: {}]   ;;  %s1682_s7 = inlined_call_operand.vmem [shape: f32[512,128], index: 7, kind: output, shape index: {}]  }
   0x1 LB: > { %s1083_s25 = sadd.s32 4294967295, %s1379_s24   ;;  %p1087_p0 = scmp.ge.s32.totalorder %s1379_s24, 1  ;;  %s1379_s24 = sphi %s1421_s24, %s17_s24  }
   0x2   : > { %p238_p1 = scmp.lt.s32.totalorder %s1379_s24, 3 }
   0x4   : > { %p239_p2 = pnand %p1087_p0, %p238_p1 }
   0x5   : > { %s1088_s28 = sshll.u32 (!%p239_p2), %s1083_s25, 5 }
   0x6   : > { %242 = sbr.rel (%p239_p2) target bundleno = 695 (0x2b7), region = 48  ;;  %p271_p3 = scmp.lt.s32.totalorder (!%p239_p2), %s1088_s28, 63 }
   0xb   : > { %v1263_v0 = vld [vmem:[%s1676_s1 + $0x8] sm:$0xff]  ;;  %v1262_v1 = vld [vmem:[%s1676_s1] sm:$0xff]  ;;  %s1684_s28 = smov (!%p271_p3, %s1088_s28), 63  ;;  %vm415_vm0 = vcmask 261120   ;;  %v1271_v7 = vld [vmem:[%s1678_s3 + $0x38] sm:$0xff] }
   0xc   : > { %470 = vmatpush.bf16.msra.mxu0 %v1263_v0  ;;  %1280 = vmatpush.bf16.msra.mxu3 %v1263_v0  ;;  %s1089_s8 = sshll.u32 %s1684_s28, 2  ;;  %v1270_v9 = vld [vmem:[%s1678_s3 + $0x30] sm:$0xff]  ;;  %v1269_v10 = vld [vmem:[%s1678_s3 + $0x28] sm:$0xff]  ;;  %v1268_v11 = vld [vmem:[%s1678_s3 + $0x20] sm:$0xff] }
   0xd   : > { %s1441_s11 = scalar_lea.vmem %s1675_s0, %s1089_s8  ;;  %669 = vmatpush.bf16.msra.mxu1 %v1271_v7  ;;  %v1267_v12 = vld [vmem:[%s1678_s3 + $0x18] sm:$0xff]  ;;  %v1266_v14 = vld [vmem:[%s1678_s3 + $0x10] sm:$0xff]  ;;  %v1265_v15 = vld [vmem:[%s1678_s3 + $0x8] sm:$0xff]  ;;  %s1091_s8 = sshll.u32 %s1684_s28, 3 }
   0xe   : > { %v1246_v2 = vld [vmem:[%s1441_s11] sm:$0xff]  ;;  %v1247_v3 = vld [vmem:[%s1441_s11 + $0x8] sm:$0xff]  ;;  %v1248_v4 = vld [vmem:[%s1441_s11 + $0x10] sm:$0xff] }
   0xf   : > { %v1249_v5 = vld [vmem:[%s1441_s11 + $0x18] sm:$0xff]  ;;  %v1250_v6 = vld [vmem:[%s1441_s11 + $0x20] sm:$0xff]  ;;  %v1251_v8 = vld [vmem:[%s1441_s11 + $0x28] sm:$0xff] }
  0x10   : > { %471 = vmatpush.bf16.msra.mxu0 %v1262_v1  ;;  %1281 = vmatpush.bf16.msra.mxu3 %v1262_v1  ;;  %v1252_v13 = vld [vmem:[%s1441_s11 + $0x30] sm:$0xff]  ;;  %v1264_v16 = vld [vmem:[%s1678_s3] sm:$0xff]  ;;  %v1253_v17 = vld [vmem:[%s1441_s11 + $0x38] sm:$0xff] }
  0x11   : > { %670 = vmatpush.bf16.msra.mxu1 %v1270_v9  ;;  %v1254_v18 = vld [vmem:[%s1441_s11 + $0x40] sm:$0xff]  ;;  %v1255_v27 = vld [vmem:[%s1441_s11 + $0x48] sm:$0xff]  ;;  %v1256_v35 = vld [vmem:[%s1441_s11 + $0x50] sm:$0xff] }
  0x12   : > { %v1487_v20 = vld [vmem:[%s1677_s2] ss:$0 sm:$0xff]  ;;  %v1259_v37 = vld [vmem:[%s1441_s11 + $0x68] sm:$0xff]  ;;  %v1257_v44 = vld [vmem:[%s1441_s11 + $0x58] sm:$0xff] }
  0x13   : > { %1164 = vmatmul.msk.bf16.vlgmr.msra.gmra.mxu0 %vm415_vm0, %v1246_v2  ;;  %1177 = vmatmul.msk.bf16.vlgmr.msra.gmra.mxu3 %vm415_vm0, %v1259_v37  ;;  %v1260_v46 = vld [vmem:[%s1441_s11 + $0x70] sm:$0xff]  ;;  %v1258_v53 = vld [vmem:[%s1441_s11 + $0x60] sm:$0xff]  ;;  %v1261_v55 = vld [vmem:[%s1441_s11 + $0x78] sm:$0xff]  ;;  %s1594_s11 = scalar_lea.vmem %s1682_s7, %s1091_s8 }
  0x14   : > { %1282 = vmatpush.bf16.msrb.mxu3 %v1271_v7  ;;  %v1279_v2 = vld [vmem:[%s1680_s5 + $0x38] sm:$0xff] }
  0x15   : > { %671 = vmatpush.bf16.msra.mxu1 %v1269_v10  ;;  %874 = vmatpush.bf16.msra.mxu2 %v1279_v2 }
  0x18   : > { %1283 = vmatpush.bf16.msrb.mxu3 %v1270_v9  ;;  %v1276_v9 = vld [vmem:[%s1680_s5 + $0x20] sm:$0xff] }
  0x19   : > { %672 = vmatpush.bf16.msra.mxu1 %v1268_v11 }
  0x1c   : > { %1284 = vmatpush.bf16.msrb.mxu3 %v1269_v10 }
  0x1d   : > { %673 = vmatpush.bf16.msra.mxu1 %v1267_v12 }
  0x20   : > { %1285 = vmatpush.bf16.msrb.mxu3 %v1268_v11 }
  0x21   : > { %674 = vmatpush.bf16.msra.mxu1 %v1266_v14 }
  0x23   : > { %1165 = vmatmul.msk.bf16.gmra.mxu0 %vm415_vm0, %v1247_v3  ;;  %1178 = vmatmul.msk.bf16.gmra.mxu3 %vm415_vm0, %v1260_v46 }
  0x24   : > { %1286 = vmatpush.bf16.msrb.mxu3 %v1267_v12 }
  0x25   : > { %675 = vmatpush.bf16.msra.mxu1 %v1265_v15 }
  0x28   : > { %1287 = vmatpush.bf16.msrb.mxu3 %v1266_v14 }
  0x29   : > { %676 = vmatpush.bf16.msra.mxu1 %v1264_v16 }
  0x2c   : > { %1288 = vmatpush.bf16.msrb.mxu3 %v1265_v15 }
  0x30   : > { %1289 = vmatpush.bf16.msrb.mxu3 %v1264_v16 }
  0x33   : > { %1166 = vmatmul.msk.bf16.gmra.mxu0 %vm415_vm0, %v1248_v4  ;;  %1179 = vmatmul.msk.bf16.gmra.mxu3 %vm415_vm0, %v1261_v55 }
  0x34   : > { %1290 = vmatpush.bf16.msra.mxu3 %v1279_v2 }
  0x43   : > { %1167 = vmatmul.msk.bf16.gmra.mxu0 %vm415_vm0, %v1249_v5 }
  0x53   : > { %1168 = vmatmul.msk.bf16.gmra.mxu0 %vm415_vm0, %v1250_v6  ;;  %v1278_v6 = vld [vmem:[%s1680_s5 + $0x30] sm:$0xff] }
  0x54   : > { %875 = vmatpush.bf16.msra.mxu2 %v1278_v6  ;;  %1291 = vmatpush.bf16.msra.mxu3 %v1278_v6 }
  0x63   : > { %1169 = vmatmul.msk.bf16.gmra.mxu0 %vm415_vm0, %v1251_v8  ;;  %v1277_v8 = vld [vmem:[%s1680_s5 + $0x28] sm:$0xff] }
  0x64   : > { %876 = vmatpush.bf16.msra.mxu2 %v1277_v8  ;;  %1292 = vmatpush.bf16.msra.mxu3 %v1277_v8 }
  0x68   : > { %877 = vmatpush.bf16.msra.mxu2 %v1276_v9  ;;  %1293 = vmatpush.bf16.msra.mxu3 %v1276_v9 }
  0x73   : > { %1170 = vmatmul.msk.bf16.gmra.mxu0 %vm415_vm0, %v1252_v13  ;;  %v1275_v13 = vld [vmem:[%s1680_s5 + $0x18] sm:$0xff] }
  0x74   : > { %878 = vmatpush.bf16.msra.mxu2 %v1275_v13  ;;  %1294 = vmatpush.bf16.msra.mxu3 %v1275_v13 }
  0x83   : > { %1171 = vmatmul.msk.bf16.gmra.mxu0 %vm415_vm0, %v1253_v17  ;;  %v1274_v17 = vld [vmem:[%s1680_s5 + $0x10] sm:$0xff] }
  0x84   : > { %879 = vmatpush.bf16.msra.mxu2 %v1274_v17  ;;  %1295 = vmatpush.bf16.msra.mxu3 %v1274_v17 }
  0x90   : > { %v473_v19 = vpop.f32.mrf.mxu0 }
  0x91   : > { %v474_v21 = vadd.f32 %v1487_v20, %v473_v19  ;;  %v1273_v19 = vld [vmem:[%s1680_s5 + $0x8] sm:$0xff] }
  0x92   : > { %880 = vmatpush.bf16.msra.mxu2 %v1273_v19  ;;  %1296 = vmatpush.bf16.msra.mxu3 %v1273_v19 }
  0x93   : > { %1172 = vmatmul.msk.bf16.gmra.mxu0 %vm415_vm0, %v1254_v18  ;;  %v553_v24 = vmax.f32 %v474_v21, 0.0  ;;  %v1272_v21 = vld [vmem:[%s1680_s5] sm:$0xff] }
  0x96   : > { %881 = vmatpush.bf16.msra.mxu2 %v1272_v21  ;;  %1297 = vmatpush.bf16.msra.mxu3 %v1272_v21 }
  0x98   : > { %v475_v22 = vpop.f32.mrf.mxu0 }
  0x99   : > { %v476_v23 = vadd.f32 %v1487_v20, %v475_v22 }
  0x9b   : > { %v554_v25 = vmax.f32 %v476_v23, 0.0 }
  0x9d   : > { %v585_v26 = vpack.c.bf16 %v554_v25, %v553_v24 }
  0x9f   : > { %677 = vmatmul.bf16.vlgmr.msra.gmra.mxu1 %v585_v26 }
  0xa0   : > { %v478_v28 = vpop.f32.mrf.mxu0 }
  0xa1   : > { %v479_v29 = vadd.f32 %v1487_v20, %v478_v28 }
  0xa3   : > { %1173 = vmatmul.msk.bf16.gmra.mxu0 %vm415_vm0, %v1255_v27  ;;  %v555_v32 = vmax.f32 %v479_v29, 0.0 }
  0xa8   : > { %v480_v30 = vpop.f32.mrf.mxu0 }
  0xa9   : > { %v481_v31 = vadd.f32 %v1487_v20, %v480_v30 }
  0xab   : > { %v556_v33 = vmax.f32 %v481_v31, 0.0 }
  0xad   : > { %v586_v34 = vpack.c.bf16 %v556_v33, %v555_v32 }
  0xaf   : > { %682 = vmatmul.bf16.gmra.mxu1 %v586_v34 }
  0xb0   : > { %v483_v36 = vpop.f32.mrf.mxu0 }
  0xb1   : > { %v484_v38 = vadd.f32 %v1487_v20, %v483_v36  ;;  %v1549_v36 = vld [vmem:[%s1679_s4] ss:$0 sm:$0xff] }
  0xb3   : > { %1174 = vmatmul.msk.bf16.gmra.mxu0 %vm415_vm0, %v1256_v35  ;;  %v557_v41 = vmax.f32 %v484_v38, 0.0 }
  0xb8   : > { %v485_v39 = vpop.f32.mrf.mxu0 }
  0xb9   : > { %v486_v40 = vadd.f32 %v1487_v20, %v485_v39 }
  0xbb   : > { %v558_v42 = vmax.f32 %v486_v40, 0.0 }
  0xbd   : > { %v587_v43 = vpack.c.bf16 %v558_v42, %v557_v41 }
  0xbf   : > { %687 = vmatmul.bf16.gmra.mxu1 %v587_v43 }
  0xc0   : > { %v488_v45 = vpop.f32.mrf.mxu0 }
  0xc1   : > { %v489_v47 = vadd.f32 %v1487_v20, %v488_v45 }
  0xc3   : > { %1175 = vmatmul.msk.bf16.gmra.mxu0 %vm415_vm0, %v1257_v44  ;;  %v559_v50 = vmax.f32 %v489_v47, 0.0 }
  0xc8   : > { %v490_v48 = vpop.f32.mrf.mxu0 }
  0xc9   : > { %v491_v49 = vadd.f32 %v1487_v20, %v490_v48 }
  0xcb   : > { %v560_v51 = vmax.f32 %v491_v49, 0.0 }
  0xcd   : > { %v588_v52 = vpack.c.bf16 %v560_v51, %v559_v50 }
  0xcf   : > { %692 = vmatmul.bf16.gmra.mxu1 %v588_v52 }
  0xd0   : > { %v493_v54 = vpop.f32.mrf.mxu0 }
  0xd1   : > { %v494_v56 = vadd.f32 %v1487_v20, %v493_v54 }
  0xd3   : > { %1176 = vmatmul.msk.bf16.gmra.mxu0 %vm415_vm0, %v1258_v53  ;;  %v561_v59 = vmax.f32 %v494_v56, 0.0 }
  0xd8   : > { %v495_v57 = vpop.f32.mrf.mxu0 }
  0xd9   : > { %v496_v58 = vadd.f32 %v1487_v20, %v495_v57 }
  0xdb   : > { %v562_v60 = vmax.f32 %v496_v58, 0.0 }
  0xdd   : > { %v589_v61 = vpack.c.bf16 %v562_v60, %v561_v59 }
  0xdf   : > { %697 = vmatmul.bf16.gmra.mxu1 %v589_v61 }
  0xe0   : > { %v498_v62 = vpop.f32.mrf.mxu0 }
  0xe1   : > { %v499_v63 = vadd.f32 %v1487_v20, %v498_v62 }
  0xe3   : > { %v563_v3 = vmax.f32 %v499_v63, 0.0 }
  0xe8   : > { %v500_v0 = vpop.f32.mrf.mxu0 }
  0xe9   : > { %v501_v1 = vadd.f32 %v1487_v20, %v500_v0 }
  0xeb   : > { %v564_v4 = vmax.f32 %v501_v1, 0.0 }
  0xed   : > { %v590_v5 = vpack.c.bf16 %v564_v4, %v563_v3 }
  0xef   : > { %702 = vmatmul.bf16.gmra.mxu1 %v590_v5 }
  0xf0   : > { %v503_v7 = vpop.f32.mrf.mxu0 }
  0xf1   : > { %v504_v10 = vadd.f32 %v1487_v20, %v503_v7 }
  0xf3   : > { %v565_v14 = vmax.f32 %v504_v10, 0.0 }
  0xf8   : > { %v505_v11 = vpop.f32.mrf.mxu0 }
  0xf9   : > { %v506_v12 = vadd.f32 %v1487_v20, %v505_v11 }
  0xfb   : > { %v566_v15 = vmax.f32 %v506_v12, 0.0 }
  0xfd   : > { %v591_v16 = vpack.c.bf16 %v566_v15, %v565_v14 }
  0xff   : > { %707 = vmatmul.bf16.gmra.mxu1 %v591_v16  ;;  %v538_v16 = vpop.f32.mrf.mxu3 }
 0x100   : > { %v508_v18 = vpop.f32.mrf.mxu0 }
 0x101   : > { %v509_v22 = vadd.f32 %v1487_v20, %v508_v18 }
 0x103   : > { %v567_v25 = vmax.f32 %v509_v22, 0.0 }
 0x108   : > { %v510_v23 = vpop.f32.mrf.mxu0 }
 0x109   : > { %v511_v24 = vadd.f32 %v1487_v20, %v510_v23 }
 0x10b   : > { %v568_v26 = vmax.f32 %v511_v24, 0.0 }
 0x10d   : > { %v592_v27 = vpack.c.bf16 %v568_v26, %v567_v25 }
 0x10f   : > { %712 = vmatmul.bf16.gmra.mxu1 %v592_v27  ;;  %v540_v27 = vpop.f32.mrf.mxu3 }
 0x110   : > { %v513_v28 = vpop.f32.mrf.mxu0 }
 0x111   : > { %v514_v29 = vadd.f32 %v1487_v20, %v513_v28 }
 0x113   : > { %v569_v32 = vmax.f32 %v514_v29, 0.0 }
 0x118   : > { %v515_v30 = vpop.f32.mrf.mxu0 }
 0x119   : > { %v516_v31 = vadd.f32 %v1487_v20, %v515_v30 }
 0x11b   : > { %v570_v33 = vmax.f32 %v516_v31, 0.0 }
 0x11c   : > { %v678_v34 = vpop.f32.mrf.mxu1 }
 0x11d   : > { %v593_v35 = vpack.c.bf16 %v570_v33, %v569_v32  ;;  %v679_v38 = vadd.f32 %v1549_v36, %v678_v34  ;;  %v543_v34 = vpop.f32.mrf.mxu3 }
 0x11f   : > { %717 = vmatmul.bf16.gmra.mxu1 %v593_v35  ;;  %v758_v41 = vmax.f32 %v679_v38, 0.0  ;;  %v539_v35 = vadd.f32 %v1487_v20, %v538_v16 }
 0x120   : > { %v518_v37 = vpop.f32.mrf.mxu0 }
 0x121   : > { %v519_v42 = vadd.f32 %v1487_v20, %v518_v37  ;;  %v541_v37 = vadd.f32 %v1487_v20, %v540_v27 }
 0x123   : > { %v571_v47 = vmax.f32 %v519_v42, 0.0  ;;  %v580_v42 = vmax.f32 %v541_v37, 0.0 }
 0x124   : > { %v680_v39 = vpop.f32.mrf.mxu1 }
 0x125   : > { %v681_v40 = vadd.f32 %v1549_v36, %v680_v39 }
 0x127   : > { %v759_v43 = vmax.f32 %v681_v40, 0.0 }
 0x128   : > { %v520_v44 = vpop.f32.mrf.mxu0 }
 0x129   : > { %v521_v45 = vadd.f32 %v1487_v20, %v520_v44  ;;  %v790_v46 = vpack.c.bf16 %v759_v43, %v758_v41  ;;  %v579_v41 = vmax.f32 %v539_v35, 0.0 }
 0x12b   : > { %v572_v48 = vmax.f32 %v521_v45, 0.0  ;;  %882 = vmatmul.bf16.vlgmr.msra.gmra.mxu2 %v790_v46  ;;  %v598_v45 = vpack.c.bf16 %v580_v42, %v579_v41  ;;  %v545_v46 = vpop.f32.mrf.mxu3 }
 0x12c   : > { %v683_v49 = vpop.f32.mrf.mxu1 }
 0x12d   : > { %v594_v50 = vpack.c.bf16 %v572_v48, %v571_v47  ;;  %v684_v52 = vadd.f32 %v1549_v36, %v683_v49  ;;  %v544_v49 = vadd.f32 %v1487_v20, %v543_v34 }
 0x12f   : > { %722 = vmatmul.bf16.gmra.mxu1 %v594_v50  ;;  %v760_v55 = vmax.f32 %v684_v52, 0.0  ;;  %v546_v50 = vadd.f32 %v1487_v20, %v545_v46 }
 0x130   : > { %v523_v51 = vpop.f32.mrf.mxu0 }
 0x131   : > { %v524_v56 = vadd.f32 %v1487_v20, %v523_v51 }
 0x133   : > { %v573_v61 = vmax.f32 %v524_v56, 0.0  ;;  %v582_v56 = vmax.f32 %v546_v50, 0.0 }
 0x134   : > { %v685_v53 = vpop.f32.mrf.mxu1 }
 0x135   : > { %v686_v54 = vadd.f32 %v1549_v36, %v685_v53 }
 0x137   : > { %v761_v57 = vmax.f32 %v686_v54, 0.0  ;;  %v548_v54 = vpop.f32.mrf.mxu3 }
 0x138   : > { %v525_v58 = vpop.f32.mrf.mxu0 }
 0x139   : > { %v526_v59 = vadd.f32 %v1487_v20, %v525_v58  ;;  %v791_v60 = vpack.c.bf16 %v761_v57, %v760_v55  ;;  %v581_v55 = vmax.f32 %v544_v49, 0.0 }
 0x13b   : > { %v574_v62 = vmax.f32 %v526_v59, 0.0  ;;  %887 = vmatmul.bf16.gmra.mxu2 %v791_v60  ;;  %v599_v59 = vpack.c.bf16 %v582_v56, %v581_v55 }
 0x13c   : > { %v688_v63 = vpop.f32.mrf.mxu1 }
 0x13d   : > { %v595_v0 = vpack.c.bf16 %v574_v62, %v573_v61  ;;  %v689_v2 = vadd.f32 %v1549_v36, %v688_v63  ;;  %v549_v63 = vadd.f32 %v1487_v20, %v548_v54 }
 0x13f   : > { %727 = vmatmul.bf16.gmra.mxu1 %v595_v0  ;;  %v762_v5 = vmax.f32 %v689_v2, 0.0  ;;  %v550_v60 = vpop.f32.mrf.mxu3 }
 0x140   : > { %v528_v1 = vpop.f32.mrf.mxu0  ;;  %v551_v0 = vadd.f32 %v1487_v20, %v550_v60 }
 0x141   : > { %v529_v6 = vadd.f32 %v1487_v20, %v528_v1 }
 0x143   : > { %v575_v11 = vmax.f32 %v529_v6, 0.0 }
 0x144   : > { %v690_v3 = vpop.f32.mrf.mxu1 }
 0x145   : > { %v691_v4 = vadd.f32 %v1549_v36, %v690_v3 }
 0x147   : > { %v763_v7 = vmax.f32 %v691_v4, 0.0  ;;  %v583_v4 = vmax.f32 %v549_v63, 0.0 }
 0x148   : > { %v530_v8 = vpop.f32.mrf.mxu0 }
 0x149   : > { %v531_v9 = vadd.f32 %v1487_v20, %v530_v8  ;;  %v792_v10 = vpack.c.bf16 %v763_v7, %v762_v5  ;;  %v584_v5 = vmax.f32 %v551_v0, 0.0 }
 0x14b   : > { %v576_v12 = vmax.f32 %v531_v9, 0.0  ;;  %892 = vmatmul.bf16.gmra.mxu2 %v792_v10  ;;  %v600_v8 = vpack.c.bf16 %v584_v5, %v583_v4 }
 0x14c   : > { %v693_v13 = vpop.f32.mrf.mxu1 }
 0x14d   : > { %v596_v14 = vpack.c.bf16 %v576_v12, %v575_v11  ;;  %v694_v17 = vadd.f32 %v1549_v36, %v693_v13 }
 0x14f   : > { %732 = vmatmul.bf16.gmra.mxu1 %v596_v14  ;;  %v764_v21 = vmax.f32 %v694_v17, 0.0 }
 0x150   : > { %v533_v15 = vpop.f32.mrf.mxu0 }
 0x151   : > { %v534_v22 = vadd.f32 %v1487_v20, %v533_v15 }
 0x153   : > { %v577_v28 = vmax.f32 %v534_v22, 0.0  ;;  %v1586_v22 = vld [vmem:[%s1681_s6] ss:$0 sm:$0xff] }
 0x154   : > { %v695_v18 = vpop.f32.mrf.mxu1 }
 0x155   : > { %v696_v19 = vadd.f32 %v1549_v36, %v695_v18 }
 0x157   : > { %v765_v23 = vmax.f32 %v696_v19, 0.0 }
 0x158   : > { %v535_v24 = vpop.f32.mrf.mxu0 }
 0x159   : > { %v536_v25 = vadd.f32 %v1487_v20, %v535_v24  ;;  %v793_v26 = vpack.c.bf16 %v765_v23, %v764_v21 }
 0x15b   : > { %v578_v29 = vmax.f32 %v536_v25, 0.0  ;;  %897 = vmatmul.bf16.gmra.mxu2 %v793_v26 }
 0x15c   : > { %v698_v30 = vpop.f32.mrf.mxu1 }
 0x15d   : > { %v597_v31 = vpack.c.bf16 %v578_v29, %v577_v28  ;;  %v699_v32 = vadd.f32 %v1549_v36, %v698_v30 }
 0x15f   : > { %737 = vmatmul.bf16.vlgmr.msrb.gmra.mxu3 %v597_v31  ;;  %v766_v39 = vmax.f32 %v699_v32, 0.0 }
 0x164   : > { %v700_v33 = vpop.f32.mrf.mxu1 }
 0x165   : > { %v701_v38 = vadd.f32 %v1549_v36, %v700_v33 }
 0x167   : > { %v767_v40 = vmax.f32 %v701_v38, 0.0 }
 0x169   : > { %v794_v43 = vpack.c.bf16 %v767_v40, %v766_v39 }
 0x16b   : > { %902 = vmatmul.bf16.gmra.mxu2 %v794_v43 }
 0x16c   : > { %v703_v44 = vpop.f32.mrf.mxu1 }
 0x16d   : > { %v704_v47 = vadd.f32 %v1549_v36, %v703_v44 }
 0x16f   : > { %742 = vmatmul.bf16.gmra.mxu3 %v598_v45  ;;  %v768_v52 = vmax.f32 %v704_v47, 0.0 }
 0x174   : > { %v705_v48 = vpop.f32.mrf.mxu1 }
 0x175   : > { %v706_v51 = vadd.f32 %v1549_v36, %v705_v48 }
 0x177   : > { %v769_v53 = vmax.f32 %v706_v51, 0.0 }
 0x179   : > { %v795_v57 = vpack.c.bf16 %v769_v53, %v768_v52 }
 0x17b   : > { %907 = vmatmul.bf16.gmra.mxu2 %v795_v57 }
 0x17c   : > { %v708_v58 = vpop.f32.mrf.mxu1 }
 0x17d   : > { %v709_v61 = vadd.f32 %v1549_v36, %v708_v58 }
 0x17f   : > { %747 = vmatmul.bf16.gmra.mxu3 %v599_v59  ;;  %v770_v2 = vmax.f32 %v709_v61, 0.0 }
 0x184   : > { %v710_v62 = vpop.f32.mrf.mxu1 }
 0x185   : > { %v711_v1 = vadd.f32 %v1549_v36, %v710_v62 }
 0x187   : > { %v771_v3 = vmax.f32 %v711_v1, 0.0 }
 0x189   : > { %v796_v6 = vpack.c.bf16 %v771_v3, %v770_v2 }
 0x18b   : > { %912 = vmatmul.bf16.gmra.mxu2 %v796_v6 }
 0x18c   : > { %v713_v7 = vpop.f32.mrf.mxu1 }
 0x18d   : > { %v714_v9 = vadd.f32 %v1549_v36, %v713_v7 }
 0x18f   : > { %752 = vmatmul.bf16.gmra.mxu3 %v600_v8  ;;  %v772_v12 = vmax.f32 %v714_v9, 0.0 }
 0x194   : > { %v715_v10 = vpop.f32.mrf.mxu1 }
 0x195   : > { %v716_v11 = vadd.f32 %v1549_v36, %v715_v10 }
 0x197   : > { %v773_v13 = vmax.f32 %v716_v11, 0.0 }
 0x199   : > { %v797_v20 = vpack.c.bf16 %v773_v13, %v772_v12 }
 0x19b   : > { %917 = vmatmul.bf16.gmra.mxu2 %v797_v20 }
 0x19c   : > { %v718_v14 = vpop.f32.mrf.mxu1 }
 0x19d   : > { %v719_v15 = vadd.f32 %v1549_v36, %v718_v14 }
 0x19f   : > { %v774_v18 = vmax.f32 %v719_v15, 0.0 }
 0x1a4   : > { %v720_v16 = vpop.f32.mrf.mxu1 }
 0x1a5   : > { %v721_v17 = vadd.f32 %v1549_v36, %v720_v16 }
 0x1a7   : > { %v775_v19 = vmax.f32 %v721_v17, 0.0 }
 0x1a9   : > { %v798_v21 = vpack.c.bf16 %v775_v19, %v774_v18 }
 0x1ab   : > { %922 = vmatmul.bf16.gmra.mxu2 %v798_v21 }
 0x1ac   : > { %v723_v23 = vpop.f32.mrf.mxu1 }
 0x1ad   : > { %v724_v26 = vadd.f32 %v1549_v36, %v723_v23 }
 0x1ae   : > { %v883_v24 = vpop.f32.mrf.mxu2 }
 0x1af   : > { %v884_v25 = vadd.f32 %v1586_v22, %v883_v24  ;;  %v776_v31 = vmax.f32 %v724_v26, 0.0 }
 0x1b1   : > { %1309 = vtanh.f32 %v884_v25 }
 0x1b4   : > { %v725_v27 = vpop.f32.mrf.mxu1 }
 0x1b5   : > { %v726_v28 = vadd.f32 %v1549_v36, %v725_v27 }
 0x1b6   : > { %v885_v29 = vpop.f32.mrf.mxu2 }
 0x1b7   : > { %v1310_v30 = vpop.eup %1309  ;;  %v777_v32 = vmax.f32 %v726_v28, 0.0  ;;  %v886_v33 = vadd.f32 %v1586_v22, %v885_v29 }
 0x1b8   : > { %995 = vst [vmem:[%s1594_s11] sm:$0xff] %v1310_v30 }
 0x1b9   : > { %1311 = vtanh.f32 %v886_v33  ;;  %v799_v34 = vpack.c.bf16 %v777_v32, %v776_v31 }
 0x1bb   : > { %927 = vmatmul.bf16.gmra.mxu2 %v799_v34 }
 0x1bc   : > { %v728_v35 = vpop.f32.mrf.mxu1 }
 0x1bd   : > { %v729_v40 = vadd.f32 %v1549_v36, %v728_v35 }
 0x1be   : > { %v888_v37 = vpop.f32.mrf.mxu2 }
 0x1bf   : > { %v1312_v38 = vpop.eup %1311  ;;  %v889_v39 = vadd.f32 %v1586_v22, %v888_v37  ;;  %v778_v45 = vmax.f32 %v729_v40, 0.0 }
 0x1c0   : > { %996 = vst [vmem:[%s1594_s11 + $0x8] sm:$0xff] %v1312_v38 }
 0x1c1   : > { %1313 = vtanh.f32 %v889_v39 }
 0x1c4   : > { %v730_v41 = vpop.f32.mrf.mxu1 }
 0x1c5   : > { %v731_v42 = vadd.f32 %v1549_v36, %v730_v41 }
 0x1c6   : > { %v890_v43 = vpop.f32.mrf.mxu2 }
 0x1c7   : > { %v1314_v44 = vpop.eup %1313  ;;  %v779_v46 = vmax.f32 %v731_v42, 0.0  ;;  %v891_v47 = vadd.f32 %v1586_v22, %v890_v43 }
 0x1c8   : > { %997 = vst [vmem:[%s1594_s11 + $0x10] sm:$0xff] %v1314_v44 }
 0x1c9   : > { %1315 = vtanh.f32 %v891_v47  ;;  %v800_v48 = vpack.c.bf16 %v779_v46, %v778_v45 }
 0x1cb   : > { %932 = vmatmul.bf16.gmra.mxu2 %v800_v48 }
 0x1cc   : > { %v733_v49 = vpop.f32.mrf.mxu1 }
 0x1cd   : > { %v734_v53 = vadd.f32 %v1549_v36, %v733_v49 }
 0x1ce   : > { %v893_v50 = vpop.f32.mrf.mxu2 }
 0x1cf   : > { %v1316_v51 = vpop.eup %1315  ;;  %v894_v52 = vadd.f32 %v1586_v22, %v893_v50  ;;  %v780_v58 = vmax.f32 %v734_v53, 0.0 }
 0x1d0   : > { %998 = vst [vmem:[%s1594_s11 + $0x18] sm:$0xff] %v1316_v51 }
 0x1d1   : > { %1317 = vtanh.f32 %v894_v52 }
 0x1d4   : > { %v735_v54 = vpop.f32.mrf.mxu1 }
 0x1d5   : > { %v736_v55 = vadd.f32 %v1549_v36, %v735_v54 }
 0x1d6   : > { %v895_v56 = vpop.f32.mrf.mxu2 }
 0x1d7   : > { %v1318_v57 = vpop.eup %1317  ;;  %v781_v59 = vmax.f32 %v736_v55, 0.0  ;;  %v896_v60 = vadd.f32 %v1586_v22, %v895_v56 }
 0x1d8   : > { %999 = vst [vmem:[%s1594_s11 + $0x20] sm:$0xff] %v1318_v57 }
 0x1d9   : > { %1319 = vtanh.f32 %v896_v60  ;;  %v801_v61 = vpack.c.bf16 %v781_v59, %v780_v58 }
 0x1db   : > { %937 = vmatmul.bf16.gmra.mxu2 %v801_v61 }
 0x1de   : > { %v898_v62 = vpop.f32.mrf.mxu2 }
 0x1df   : > { %v1320_v63 = vpop.eup %1319  ;;  %v899_v0 = vadd.f32 %v1586_v22, %v898_v62 }
 0x1e0   : > { %1000 = vst [vmem:[%s1594_s11 + $0x28] sm:$0xff] %v1320_v63 }
 0x1e1   : > { %1321 = vtanh.f32 %v899_v0 }
 0x1e2   : > { %v738_v1 = vpop.f32.mrf.mxu3 }
 0x1e3   : > { %v739_v5 = vadd.f32 %v1549_v36, %v738_v1 }
 0x1e5   : > { %v782_v8 = vmax.f32 %v739_v5, 0.0 }
 0x1e6   : > { %v900_v2 = vpop.f32.mrf.mxu2 }
 0x1e7   : > { %v1322_v3 = vpop.eup %1321  ;;  %v901_v4 = vadd.f32 %v1586_v22, %v900_v2 }
 0x1e8   : > { %1001 = vst [vmem:[%s1594_s11 + $0x30] sm:$0xff] %v1322_v3 }
 0x1e9   : > { %1323 = vtanh.f32 %v901_v4 }
 0x1ea   : > { %v740_v6 = vpop.f32.mrf.mxu3 }
 0x1eb   : > { %v741_v7 = vadd.f32 %v1549_v36, %v740_v6 }
 0x1ed   : > { %v783_v9 = vmax.f32 %v741_v7, 0.0 }
 0x1ee   : > { %v903_v10 = vpop.f32.mrf.mxu2 }
 0x1ef   : > { %v1324_v11 = vpop.eup %1323  ;;  %v802_v12 = vpack.c.bf16 %v783_v9, %v782_v8  ;;  %v904_v13 = vadd.f32 %v1586_v22, %v903_v10 }
 0x1f0   : > { %1002 = vst [vmem:[%s1594_s11 + $0x38] sm:$0xff] %v1324_v11 }
 0x1f1   : > { %1325 = vtanh.f32 %v904_v13  ;;  %942 = vmatmul.bf16.vlgmr.msra.gmra.mxu3 %v802_v12 }
 0x1f2   : > { %v743_v20 = vpop.f32.mrf.mxu3 }
 0x1f3   : > { %v744_v17 = vadd.f32 %v1549_v36, %v743_v20 }
 0x1f5   : > { %v784_v21 = vmax.f32 %v744_v17, 0.0 }
 0x1f6   : > { %v905_v14 = vpop.f32.mrf.mxu2 }
 0x1f7   : > { %v1326_v15 = vpop.eup %1325  ;;  %v906_v16 = vadd.f32 %v1586_v22, %v905_v14 }
 0x1f8   : > { %1003 = vst [vmem:[%s1594_s11 + $0x40] sm:$0xff] %v1326_v15 }
 0x1f9   : > { %1327 = vtanh.f32 %v906_v16 }
 0x1fa   : > { %v745_v18 = vpop.f32.mrf.mxu3 }
 0x1fb   : > { %v746_v19 = vadd.f32 %v1549_v36, %v745_v18 }
 0x1fd   : > { %v785_v23 = vmax.f32 %v746_v19, 0.0 }
 0x1fe   : > { %v908_v24 = vpop.f32.mrf.mxu2 }
 0x1ff   : > { %v1328_v25 = vpop.eup %1327  ;;  %v909_v26 = vadd.f32 %v1586_v22, %v908_v24  ;;  %v803_v27 = vpack.c.bf16 %v785_v23, %v784_v21 }
 0x200   : > { %1004 = vst [vmem:[%s1594_s11 + $0x48] sm:$0xff] %v1328_v25 }
 0x201   : > { %1329 = vtanh.f32 %v909_v26  ;;  %947 = vmatmul.bf16.gmra.mxu3 %v803_v27 }
 0x202   : > { %v748_v28 = vpop.f32.mrf.mxu3 }
 0x203   : > { %v749_v32 = vadd.f32 %v1549_v36, %v748_v28 }
 0x205   : > { %v786_v35 = vmax.f32 %v749_v32, 0.0 }
 0x206   : > { %v910_v29 = vpop.f32.mrf.mxu2 }
 0x207   : > { %v1330_v30 = vpop.eup %1329  ;;  %v911_v31 = vadd.f32 %v1586_v22, %v910_v29 }
 0x208   : > { %1005 = vst [vmem:[%s1594_s11 + $0x50] sm:$0xff] %v1330_v30 }
 0x209   : > { %1331 = vtanh.f32 %v911_v31 }
 0x20a   : > { %v750_v33 = vpop.f32.mrf.mxu3 }
 0x20b   : > { %v751_v34 = vadd.f32 %v1549_v36, %v750_v33 }
 0x20d   : > { %v787_v37 = vmax.f32 %v751_v34, 0.0 }
 0x20e   : > { %v913_v38 = vpop.f32.mrf.mxu2 }
 0x20f   : > { %v1332_v39 = vpop.eup %1331  ;;  %v914_v40 = vadd.f32 %v1586_v22, %v913_v38  ;;  %v804_v41 = vpack.c.bf16 %v787_v37, %v786_v35 }
 0x210   : > { %1006 = vst [vmem:[%s1594_s11 + $0x58] sm:$0xff] %v1332_v39 }
 0x211   : > { %1333 = vtanh.f32 %v914_v40  ;;  %952 = vmatmul.bf16.gmra.mxu3 %v804_v41 }
 0x212   : > { %v753_v42 = vpop.f32.mrf.mxu3 }
 0x213   : > { %v754_v46 = vadd.f32 %v1549_v36, %v753_v42 }
 0x215   : > { %v788_v49 = vmax.f32 %v754_v46, 0.0 }
 0x216   : > { %v915_v43 = vpop.f32.mrf.mxu2 }
 0x217   : > { %v1334_v44 = vpop.eup %1333  ;;  %v916_v45 = vadd.f32 %v1586_v22, %v915_v43 }
 0x218   : > { %1007 = vst [vmem:[%s1594_s11 + $0x60] sm:$0xff] %v1334_v44 }
 0x219   : > { %1335 = vtanh.f32 %v916_v45 }
 0x21a   : > { %v755_v47 = vpop.f32.mrf.mxu3 }
 0x21b   : > { %v756_v48 = vadd.f32 %v1549_v36, %v755_v47 }
 0x21d   : > { %v789_v50 = vmax.f32 %v756_v48, 0.0 }
 0x21e   : > { %v918_v51 = vpop.f32.mrf.mxu2 }
 0x21f   : > { %v1336_v52 = vpop.eup %1335  ;;  %v919_v53 = vadd.f32 %v1586_v22, %v918_v51  ;;  %v805_v54 = vpack.c.bf16 %v789_v50, %v788_v49 }
 0x220   : > { %1008 = vst [vmem:[%s1594_s11 + $0x68] sm:$0xff] %v1336_v52 }
 0x221   : > { %1337 = vtanh.f32 %v919_v53  ;;  %957 = vmatmul.bf16.gmra.mxu3 %v805_v54 }
 0x226   : > { %v920_v55 = vpop.f32.mrf.mxu2 }
 0x227   : > { %v1338_v56 = vpop.eup %1337  ;;  %v921_v57 = vadd.f32 %v1586_v22, %v920_v55 }
 0x228   : > { %1009 = vst [vmem:[%s1594_s11 + $0x70] sm:$0xff] %v1338_v56 }
 0x229   : > { %1339 = vtanh.f32 %v921_v57 }
 0x22e   : > { %v923_v36 = vpop.f32.mrf.mxu2 }
 0x22f   : > { %v1340_v58 = vpop.eup %1339  ;;  %v924_v59 = vadd.f32 %v1586_v22, %v923_v36 }
 0x230   : > { %1010 = vst [vmem:[%s1594_s11 + $0x78] sm:$0xff] %v1340_v58 }
 0x231   : > { %1341 = vtanh.f32 %v924_v59 }
 0x236   : > { %v925_v60 = vpop.f32.mrf.mxu2 }
 0x237   : > { %v1342_v61 = vpop.eup %1341  ;;  %v926_v62 = vadd.f32 %v1586_v22, %v925_v60 }
 0x238   : > { %1011 = vst [vmem:[%s1594_s11 + $0x80] sm:$0xff] %v1342_v61 }
 0x239   : > { %1343 = vtanh.f32 %v926_v62 }
 0x23e   : > { %v928_v63 = vpop.f32.mrf.mxu2 }
 0x23f   : > { %v1344_v0 = vpop.eup %1343  ;;  %v929_v1 = vadd.f32 %v1586_v22, %v928_v63 }
 0x240   : > { %1012 = vst [vmem:[%s1594_s11 + $0x88] sm:$0xff] %v1344_v0 }
 0x241   : > { %1345 = vtanh.f32 %v929_v1 }
 0x246   : > { %v930_v2 = vpop.f32.mrf.mxu2 }
 0x247   : > { %v1346_v3 = vpop.eup %1345  ;;  %v931_v4 = vadd.f32 %v1586_v22, %v930_v2 }
 0x248   : > { %1013 = vst [vmem:[%s1594_s11 + $0x90] sm:$0xff] %v1346_v3 }
 0x249   : > { %1347 = vtanh.f32 %v931_v4 }
 0x24e   : > { %v933_v5 = vpop.f32.mrf.mxu2 }
 0x24f   : > { %v1348_v6 = vpop.eup %1347  ;;  %v934_v7 = vadd.f32 %v1586_v22, %v933_v5 }
 0x250   : > { %1014 = vst [vmem:[%s1594_s11 + $0x98] sm:$0xff] %v1348_v6 }
 0x251   : > { %1349 = vtanh.f32 %v934_v7 }
 0x256   : > { %v935_v8 = vpop.f32.mrf.mxu2 }
 0x257   : > { %v1350_v9 = vpop.eup %1349  ;;  %v936_v10 = vadd.f32 %v1586_v22, %v935_v8 }
 0x258   : > { %1015 = vst [vmem:[%s1594_s11 + $0xa0] sm:$0xff] %v1350_v9 }
 0x259   : > { %1351 = vtanh.f32 %v936_v10 }
 0x25e   : > { %v938_v11 = vpop.f32.mrf.mxu2 }
 0x25f   : > { %v1352_v12 = vpop.eup %1351  ;;  %v939_v13 = vadd.f32 %v1586_v22, %v938_v11 }
 0x260   : > { %1016 = vst [vmem:[%s1594_s11 + $0xa8] sm:$0xff] %v1352_v12 }
 0x261   : > { %1353 = vtanh.f32 %v939_v13 }
 0x266   : > { %v940_v20 = vpop.f32.mrf.mxu2 }
 0x267   : > { %v1354_v14 = vpop.eup %1353  ;;  %v941_v15 = vadd.f32 %v1586_v22, %v940_v20 }
 0x268   : > { %1017 = vst [vmem:[%s1594_s11 + $0xb0] sm:$0xff] %v1354_v14 }
 0x269   : > { %1355 = vtanh.f32 %v941_v15 }
 0x26f   : > { %v1356_v16 = vpop.eup %1355 }
 0x270   : > { %1018 = vst [vmem:[%s1594_s11 + $0xb8] sm:$0xff] %v1356_v16 }
 0x274   : > { %v943_v17 = vpop.f32.mrf.mxu3 }
 0x275   : > { %v944_v18 = vadd.f32 %v1586_v22, %v943_v17 }
 0x277   : > { %1357 = vtanh.f32 %v944_v18 }
 0x27c   : > { %v945_v19 = vpop.f32.mrf.mxu3 }
 0x27d   : > { %v1358_v21 = vpop.eup %1357  ;;  %v946_v23 = vadd.f32 %v1586_v22, %v945_v19 }
 0x27e   : > { %1019 = vst [vmem:[%s1594_s11 + $0xc0] sm:$0xff] %v1358_v21 }
 0x27f   : > { %1359 = vtanh.f32 %v946_v23 }
 0x284   : > { %v948_v24 = vpop.f32.mrf.mxu3 }
 0x285   : > { %v1360_v25 = vpop.eup %1359  ;;  %v949_v26 = vadd.f32 %v1586_v22, %v948_v24 }
 0x286   : > { %1020 = vst [vmem:[%s1594_s11 + $0xc8] sm:$0xff] %v1360_v25 }
 0x287   : > { %1361 = vtanh.f32 %v949_v26 }
 0x28c   : > { %v950_v27 = vpop.f32.mrf.mxu3 }
 0x28d   : > { %v1362_v28 = vpop.eup %1361  ;;  %v951_v29 = vadd.f32 %v1586_v22, %v950_v27 }
 0x28e   : > { %1021 = vst [vmem:[%s1594_s11 + $0xd0] sm:$0xff] %v1362_v28 }
 0x28f   : > { %1363 = vtanh.f32 %v951_v29 }
 0x294   : > { %v953_v30 = vpop.f32.mrf.mxu3 }
 0x295   : > { %v1364_v31 = vpop.eup %1363  ;;  %v954_v32 = vadd.f32 %v1586_v22, %v953_v30 }
 0x296   : > { %1022 = vst [vmem:[%s1594_s11 + $0xd8] sm:$0xff] %v1364_v31 }
 0x297   : > { %1365 = vtanh.f32 %v954_v32 }
 0x29c   : > { %v955_v33 = vpop.f32.mrf.mxu3 }
 0x29d   : > { %v1366_v34 = vpop.eup %1365  ;;  %v956_v35 = vadd.f32 %v1586_v22, %v955_v33 }
 0x29e   : > { %1023 = vst [vmem:[%s1594_s11 + $0xe0] sm:$0xff] %v1366_v34 }
 0x29f   : > { %1367 = vtanh.f32 %v956_v35 }
 0x2a4   : > { %v958_v37 = vpop.f32.mrf.mxu3 }
 0x2a5   : > { %v1368_v38 = vpop.eup %1367  ;;  %v959_v39 = vadd.f32 %v1586_v22, %v958_v37 }
 0x2a6   : > { %1024 = vst [vmem:[%s1594_s11 + $0xe8] sm:$0xff] %v1368_v38 }
 0x2a7   : > { %1369 = vtanh.f32 %v959_v39 }
 0x2ac   : > { %v960_v40 = vpop.f32.mrf.mxu3 }
 0x2ad   : > { %v1370_v41 = vpop.eup %1369  ;;  %v961_v42 = vadd.f32 %v1586_v22, %v960_v40 }
 0x2ae   : > { %1025 = vst [vmem:[%s1594_s11 + $0xf0] sm:$0xff] %v1370_v41 }
 0x2af   : > { %1371 = vtanh.f32 %v961_v42 }
 0x2b5   : > { %v1372_v43 = vpop.eup %1371 }
 0x2b6   : > { %1026 = vst [vmem:[%s1594_s11 + $0xf8] sm:$0xff] %v1372_v43 }
 0x2b7 PF: > { %s17_s24 = sadd.s32 1, %s1379_s24  }
 0x2b8   : > { %p14_p4 = scmp.ge.s32.totalorder %s17_s24, 4  }
 0x2ba   :  { %16 = sbr.rel (!%p14_p4) target bundleno = 1 (0x1), region = 78 }

</bundles_post_ra>
